<compile_context>
chip_gen: v6e
topology: v6e:2x2x1
jax: 0.10.0
libtpu: 0.0.40
codegen_flags: <defaults>
</compile_context>

<pallas_src>
import jax
import jax.numpy as jnp
import numpy as np
from jax import lax
from jax.experimental import pallas as pl
from jax.experimental.pallas import tpu as pltpu

VOCAB = 5000          # TokenEmbedding hard-codes nn.Embedding(5000, d_model)
PADDING_IDX = 1       # padding_idx=1 -> that embedding row is zeros


def _round_up(x, m):
    return (x + m - 1) // m * m


def _embed_kernel(ids_ref, table_hbm, pos_ref, o_ref, rowbuf, sem):
    # ids_ref:   (B*S_pad,) int32 SMEM (scalar prefetch) -- token ids, used as DMA addresses
    # table_hbm: (V, D) f32 ref left in HBM (pl.ANY) -- gathered row by row via DMA
    # pos_ref:   (Ts, D) f32 VMEM block -- positional-encoding rows for this tile
    # o_ref:     (1, Ts, D) f32 VMEM output block
    # rowbuf:    (Ts, D) f32 VMEM scratch -- gather destination
    # sem:       (1,) DMA semaphore shared by all row copies of this step
    b = pl.program_id(0)
    s = pl.program_id(1)
    Ts, D = rowbuf.shape
    V = table_hbm.shape[0]
    S_pad = pl.num_programs(1) * Ts
    base = b * S_pad + s * Ts

    # Issue one row DMA per token of this tile (gather from HBM -> VMEM scratch).
    def issue(t, carry):
        tok = jnp.clip(ids_ref[base + t], 0, V - 1)   # keep the DMA in-bounds for bad ids
        pltpu.make_async_copy(table_hbm.at[tok], rowbuf.at[t], sem.at[0]).start()
        return carry

    lax.fori_loop(0, Ts, issue, 0)

    if D % 128 == 0 and Ts % 8 == 0:
        # Aggregate wait: the Ts row copies sum to exactly rowbuf's byte count
        # (same trick as the official paged-attention kernel).
        pltpu.make_async_copy(rowbuf, rowbuf, sem.at[0]).wait()
    else:
        # Fallback: drain one row-sized completion per issued copy.
        def drain(t, carry):
            pltpu.make_async_copy(table_hbm.at[0], rowbuf.at[0], sem.at[0]).wait()
            return carry
        lax.fori_loop(0, Ts, drain, 0)

    # Whole-tile vectorized add + one contiguous (lane-dense when D % 128 == 0) store.
    o_ref[0, :, :] = rowbuf[...] + pos_ref[...]


def transformer_embedding(token_ids, emb_table, pos_encoding, *, tile_seq=256):
    """token_ids: (B, S) int32; emb_table: (VOCAB, D) f32; pos_encoding: (max_len, D) f32."""
    B, S = token_ids.shape
    V, D = emb_table.shape
    assert S <= pos_encoding.shape[0], "sequence length exceeds positional-encoding max_len"

    # Sequence tile: multiple of 8 sublanes, at most tile_seq tokens per grid step.
    Ts = _round_up(min(tile_seq, _round_up(S, 8)), 8)
    S_pad = _round_up(S, Ts)

    ids = token_ids.astype(jnp.int32)
    if S_pad != S:
        ids = jnp.pad(ids, ((0, 0), (0, S_pad - S)), constant_values=PADDING_IDX)
    ids_flat = ids.reshape(-1)

    pos_s = pos_encoding[:S].astype(jnp.float32)
    if S_pad != S:
        pos_s = jnp.pad(pos_s, ((0, S_pad - S), (0, 0)))

    # VMEM budget: gather scratch + double-buffered pos blocks + double-buffered output
    # blocks (+ headroom), clamped to this chip's physical VMEM capacity.
    d_pad = _round_up(D, 128)
    need = (1 + 2 + 2) * Ts * d_pad * 4
    try:
        cap = int(pltpu.get_tpu_info().vmem_capacity_bytes)
    except Exception:
        cap = 64 << 20                      # conservative (v7x per-TensorCore VMEM)
    vmem_bytes = int(min(max(need + (4 << 20), 16 << 20), cap - (8 << 20)))

    grid_spec = pltpu.PrefetchScalarGridSpec(
        num_scalar_prefetch=1,
        grid=(B, S_pad // Ts),
        in_specs=[
            pl.BlockSpec(memory_space=pl.ANY),                    # table stays in HBM
            pl.BlockSpec((Ts, D), lambda b, s, ids: (s, 0)),      # pos rows for this tile
        ],
        out_specs=pl.BlockSpec((1, Ts, D), lambda b, s, ids: (b, s, 0)),
        scratch_shapes=[
            pltpu.VMEM((Ts, D), jnp.float32),                     # gather destination
            pltpu.SemaphoreType.DMA((1,)),
        ],
    )

    out = pl.pallas_call(
        _embed_kernel,
        out_shape=jax.ShapeDtypeStruct((B, S_pad, D), jnp.float32),
        grid_spec=grid_spec,
        compiler_params=pltpu.CompilerParams(
            dimension_semantics=("parallel", "parallel"),   # independent tiles
            vmem_limit_bytes=vmem_bytes,
        ),
    )(ids_flat, emb_table, pos_s)

    return out[:, :S, :]


def make_positional_encoding(max_len, d_model):
    """Sinusoid encoding, matching PositionalEncoding.__init__ exactly."""
    pos = np.arange(max_len, dtype=np.float32)[:, None]             # (max_len, 1)
    _2i = np.arange(0, d_model, 2, dtype=np.float32)                 # (d_model/2,)
    enc = np.zeros((max_len, d_model), dtype=np.float32)
    div = 10000.0 ** (_2i / d_model)
    enc[:, 0::2] = np.sin(pos / div)
    enc[:, 1::2] = np.cos(pos / div)
    return jnp.asarray(enc)


def make_embedding_table(key, d_model):
    """nn.Embedding(5000, d_model, padding_idx=1): N(0,1) init, padding row zeroed."""
    w = jax.random.normal(key, (VOCAB, d_model), dtype=jnp.float32)
    w = w.at[PADDING_IDX].set(0.0)
    return w


if __name__ == "__main__":
    # Small shapes consistent with the module's forward: x is (batch, seq) of int ids.
    # d_model=128 keeps the output store lane-dense (last dim a multiple of 128).
    B, S, D, MAX_LEN = 2, 8, 128, 64

    key = jax.random.PRNGKey(0)
    k_emb, k_ids = jax.random.split(key)

    emb_table = make_embedding_table(k_emb, D)
    pos_enc = make_positional_encoding(MAX_LEN, D)
    token_ids = jax.random.randint(k_ids, (B, S), 0, VOCAB, dtype=jnp.int32)

    out = transformer_embedding(token_ids, emb_table, pos_enc)
    out = jax.block_until_ready(out)

    # Reference check in plain JAX (eval-mode dropout == identity).
    ref = emb_table[token_ids] + pos_enc[:S][None, :, :]
    np.testing.assert_allclose(np.asarray(out), np.asarray(ref), rtol=1e-6, atol=1e-6)

    print("KERNEL_OK")
</pallas_src>

<mosaic_0001>
module attributes {stable_mosaic.version = 11 : i64} {
  func.func @_embed_kernel(%arg0: i32, %arg1: i32, %arg2: memref<16xi32, #tpu.memory_space<smem>>, %arg3: memref<5000x128xf32, #tpu.memory_space<any>>, %arg4: memref<8x128xf32, #tpu.memory_space<vmem>>, %arg5: memref<1x8x128xf32, #tpu.memory_space<vmem>>, %arg6: memref<8x128xf32, #tpu.memory_space<vmem>>, %arg7: memref<1x!tpu.dma_semaphore, #tpu.memory_space<semaphore_mem>>) attributes {dimension_semantics = [#tpu.dimension_semantics<parallel>, #tpu.dimension_semantics<parallel>], iteration_bounds = array<i64: 2, 1>, scalar_prefetch = 1 : i64, scratch_operands = 2 : i64, tpu.core_type = #tpu.core_type<tc>, window_params = [{}, {transform_indices = @transform_1, window_bounds = array<i64: 8, 128>}, {transform_indices = @transform_2, window_bounds = array<i64: 1, 8, 128>}]} {
    %c8_i32 = arith.constant 8 : i32
    %0 = arith.muli %arg0, %c8_i32 : i32
    %c8_i32_0 = arith.constant 8 : i32
    %1 = arith.muli %arg1, %c8_i32_0 : i32
    %2 = arith.addi %0, %1 : i32
    %c0_i32 = arith.constant 0 : i32
    %c8_i32_1 = arith.constant 8 : i32
    %3 = arith.addi %c0_i32, %c8_i32_1 : i32
    %c1_i32 = arith.constant 1 : i32
    scf.for %arg8 = %c0_i32 to %3 step %c1_i32  : i32 {
      %12 = arith.addi %2, %arg8 : i32
      %13 = arith.index_cast %12 : i32 to index
      %14 = memref.load %arg2[%13] : memref<16xi32, #tpu.memory_space<smem>>
      %c0_i32_10 = arith.constant 0 : i32
      %c4999_i32 = arith.constant 4999 : i32
      %15 = arith.maxsi %c0_i32_10, %14 : i32
      %16 = arith.minsi %c4999_i32, %15 : i32
      %c0_i32_11 = arith.constant 0 : i32
      %c0_i32_12 = arith.constant 0 : i32
      %17 = tpu.memref_slice %arg3[%16, %c0_i32_12] : memref<5000x128xf32, #tpu.memory_space<any>> -> memref<1x128xf32, #tpu.memory_space<any>>
      %18 = tpu.memref_squeeze %17 : memref<1x128xf32, #tpu.memory_space<any>> -> memref<128xf32, #tpu.memory_space<any>>
      %c0_i32_13 = arith.constant 0 : i32
      %19 = tpu.memref_slice %arg6[%arg8, %c0_i32_13] : memref<8x128xf32, #tpu.memory_space<vmem>> -> memref<1x128xf32, #tpu.memory_space<vmem>>
      %20 = tpu.memref_squeeze %19 : memref<1x128xf32, #tpu.memory_space<vmem>> -> memref<128xf32, #tpu.memory_space<vmem>>
      %21 = tpu.memref_slice %arg7[%c0_i32_11] : memref<1x!tpu.dma_semaphore, #tpu.memory_space<semaphore_mem>> -> memref<1x!tpu.dma_semaphore, #tpu.memory_space<semaphore_mem>>
      %22 = tpu.memref_squeeze %21 : memref<1x!tpu.dma_semaphore, #tpu.memory_space<semaphore_mem>> -> memref<!tpu.dma_semaphore, #tpu.memory_space<semaphore_mem>>
      tpu.enqueue_dma source(%18 : memref<128xf32, #tpu.memory_space<any>>) target(%20 : memref<128xf32, #tpu.memory_space<vmem>>) target_semaphore(%22 : memref<!tpu.dma_semaphore, #tpu.memory_space<semaphore_mem>>)
    }
    %c8_i32_2 = arith.constant 8 : i32
    %c0_i32_3 = arith.constant 0 : i32
    %4 = tpu.memref_slice %arg7[%c0_i32_3] : memref<1x!tpu.dma_semaphore, #tpu.memory_space<semaphore_mem>> -> memref<1x!tpu.dma_semaphore, #tpu.memory_space<semaphore_mem>>
    %5 = tpu.memref_squeeze %4 : memref<1x!tpu.dma_semaphore, #tpu.memory_space<semaphore_mem>> -> memref<!tpu.dma_semaphore, #tpu.memory_space<semaphore_mem>>
    tpu.wait_dma2 semaphore(%5 : memref<!tpu.dma_semaphore, #tpu.memory_space<semaphore_mem>>) src(%arg6 : memref<8x128xf32, #tpu.memory_space<vmem>>) dst(%arg6 : memref<8x128xf32, #tpu.memory_space<vmem>>)
    %c0 = arith.constant 0 : index
    %c0_4 = arith.constant 0 : index
    %6 = vector.load %arg6[%c0, %c0_4] : memref<8x128xf32, #tpu.memory_space<vmem>>, vector<8x128xf32>
    %c0_5 = arith.constant 0 : index
    %c0_6 = arith.constant 0 : index
    %7 = vector.load %arg4[%c0_5, %c0_6] : memref<8x128xf32, #tpu.memory_space<vmem>>, vector<8x128xf32>
    %8 = arith.addf %6, %7 : vector<8x128xf32>
    %c0_7 = arith.constant 0 : index
    %c0_8 = arith.constant 0 : index
    %c0_9 = arith.constant 0 : index
    %9 = vector.load %arg5[%c0_7, %c0_8, %c0_9] : memref<1x8x128xf32, #tpu.memory_space<vmem>>, vector<1x8x128xf32>
    %10 = vector.shape_cast %9 : vector<1x8x128xf32> to vector<8x128xf32>
    %11 = vector.shape_cast %8 : vector<8x128xf32> to vector<1x8x128xf32>
    tpu.vector_store %arg5[%c0_7, %c0_8, %c0_9], %11 {strides = array<i32>} : memref<1x8x128xf32, #tpu.memory_space<vmem>>, vector<1x8x128xf32>,
    return
  }
  func.func @transform_1(%arg0: i32, %arg1: i32, %arg2: memref<16xi32, #tpu.memory_space<smem>>) -> (i32, i32) {
    %c0_i32 = arith.constant 0 : i32
    %c0_i32_0 = arith.constant 0 : i32
    return %arg1, %c0_i32 : i32, i32
  }
  func.func @transform_2(%arg0: i32, %arg1: i32, %arg2: memref<16xi32, #tpu.memory_space<smem>>) -> (i32, i32, i32) {
    %c0_i32 = arith.constant 0 : i32
    %c0_i32_0 = arith.constant 0 : i32
    return %arg0, %arg1, %c0_i32 : i32, i32, i32
  }
}

</mosaic_0001>

<bundles_post_ra>
// kernel: tpu_custom_call.1
= control target key start
LH: loop header
LB: loop body
LE: loop exit
PB: predicated region body
PF: predicated region fallthrough
CT: control target
= control target key end

     0   :  { %s516_s12 = smov [#allocation5]   ;;  %s691_s0 = inlined_call_operand.hbm [shape: s32[16], index: 0, kind: input, shape index: {}]   ;;  %s692_s1 = inlined_call_operand.hbm [shape: f32[5000,128], index: 1, kind: input, shape index: {}]   ;;  %s693_s2 = inlined_call_operand.hbm [shape: f32[8,128], index: 2, kind: input, shape index: {}]   ;;  %s694_s3 = inlined_call_operand.hbm [shape: f32[2,8,128], index: 3, kind: output, shape index: {}]  }
   0x1   :  { %9 = dma.hbm_to_smem %s691_s0, 16, %s516_s12, [#allocation4] }
   0x2   :  { %476 = dma.done.wait [#allocation4], 16 }
   0x3   :  { %477 = vsyncadd [#allocation4], 4294967280 }
   0x4   :  { %11 = sfence }
   0x5   :  { %12 = vsyncpa [#allocation7], 0 }
   0x6   :  { %13 = vsyncpa [#allocation8], 0 }
   0x7   :  { %15 = vsyncpa [#allocation8 + $0x1], 0  ;;  %s543_s15 = smov 0   ;;  %s545_s16 = smov 0  }
   0x8   :  { %s547_s17 = smov 0   ;;  %s549_s18 = smov 0  }
   0x9   :  { %s551_s19 = smov 0   ;;  %s553_s20 = smov 0  }
   0xa LB: > { %s270_s0 = sadd.s32 4294967295, %s510_s20   ;;  %s271_s21 = sadd.s32 4294967294, %s510_s20   ;;  %s510_s20 = sphi %s553_s20, %s21_s20   ;;  %s506_s19 = sphi %s551_s19, %s704_s19   ;;  %s502_s18 = sphi %s549_s18, %s703_s18   ;;  %s498_s17 = sphi %s547_s17, %s702_s17   ;;  %s494_s16 = sphi %s545_s16, %s701_s16   ;;  %s490_s15 = sphi %s543_s15, %s700_s15  }
   0xb   : > { %s33_s22 = sadd.s32 1, %s506_s19  ;;  %s68_s23 = sadd.s32 1, %s498_s17 }
   0xc   : > { %p35_p0 = scmp.ge.s32.totalorder %s33_s22, 2  ;;  %p78_p1 = scmp.ne.s32.totalorder %s498_s17, %s494_s16 }
   0xd   : > { %p79_p2 = scmp.eq.s32.totalorder %s270_s0, 1  ;;  %p84_p3 = scmp.ne.s32.totalorder %s494_s16, %s490_s15 }
   0xe   : > { %s706_s22 = smov (%p35_p0, %s33_s22), 0  ;;  %p85_p5 = scmp.eq.s32.totalorder %s271_s21, 1 }
   0xf   : > { %p583_p4 = por %p79_p2, %p78_p1  ;;  %s63_s25 = ssub.s32 %s506_s19, %s706_s22 }
  0x10   : > { %p272_p6 = scmp.ge.s32.totalorder %s510_s20, 1  ;;  %p66_p7 = scmp.eq.s32.totalorder %s63_s25, 0 }
  0x11   : > { %p590_p8 = por %p85_p5, %p84_p3  ;;  %p92_p9 = scmp.lt.s32.totalorder %s510_s20, 3 }
  0x12   : > { %s596_s27 = scalar_select %p66_p7, %s498_s17, %s68_s23  }
  0x13   : > { %p598_p10 = pnand %p272_p6, %p92_p9  ;;  %p602_p11 = scmp.eq.s32.totalorder %s270_s0, 0 }
  0x14   : > { %s517_s30 = smov [#allocation6]  }
  0x15   : > { %p297_p12 = pneg %p598_p10  ;;  %s107_s4 = sshll.u32 %s517_s30, 4  ;;  %s108_s4 = int_to_ptr.vmem [resolvable:$true] %s107_s4 }
  0x16   : > { %s385_s5 = scalar_lea.vmem %s108_s4, 128  ;;  %p393_p5 = scmp.lt.s32.totalorder %s108_s4, %s108_s4 }
  0x17   : > { %p298_p13 = pnand %p602_p11, %p297_p12  ;;  %p386_p1 = scmp.ne.s32.totalorder %s108_s4, %s385_s5 }
  0x18   : > { %p394_p6 = scmp.lt.s32.totalorder %s385_s5, %s385_s5 }
  0x19   : > { %p376_p0 = pneg %p298_p13 }
  0x1a   : > { %p395_p7 = por %p394_p6, %p393_p5 }
  0x1b   : > { %p388_p2 = pnand %p386_p1, %p376_p0 }
  0x1d   : > { %p389_p3 = pneg %p388_p2 }
  0x1f   : > { %p396_p9 = pnand %p395_p7, %p389_p3 }
  0x21   : > { %399 = shalt.err (!%p396_p9)
}
  0x22   : > { %300 = dma.hbm_to_vmem [thread:$0]  (!%p298_p13), %s693_s2, 128, %s108_s4, [#allocation7]  }
  0x23   : > { %120 = sbr.rel (%p598_p10) target bundleno = 109 (0x6d), region = 24 }
  0x28   : > { %479 = dma.done.wait (%p602_p11), [#allocation7], 128  }
  0x29   : > { %481 = vsyncadd (%p602_p11), [#allocation7], 4294967168  ;;  %s132_s8 = sand.u32 1, %s494_s16   ;;  %s626_s12 = smov 0  }
  0x2a   : > { %s623_s10 = sshll.u32 %s132_s8, 3 }
  0x2b   : > { %s134_s11 = scalar_lea.vmem [#allocation9], %s623_s10 }
  0x2c LB: >> { %s699_s9 = sshll.u32 %s502_s18, 3  ;;  %s152_s0 = scalar_lea.vmem [#allocation2], %s514_s12  ;;  %s514_s12 = sphi %s626_s12, %s143_s12  }
  0x2d   : >> { %s144_s13 = sadd.s32 %s514_s12, %s699_s9  ;;  %s160_s21 = sshll.u32 %s152_s0, 4  ;;  %s161_s21 = int_to_ptr.vmem [resolvable:$true] %s160_s21 }
  0x2e   : >> { %s145_s14 = sld [smem:[#allocation5 + %s144_s13]]  ;;  %s402_s6 = scalar_lea.hbm %s692_s1, 80000 }
  0x34   : >> { %p146_p10 = scmp.gt.s32.totalorder %s145_s14, 0  ;;  %p278_p11 = scmp.lt.s32.totalorder %s145_s14, 4999 }
  0x36   : >> { %s708_s14 = smov (!%p146_p10, %s145_s14), 0 }
  0x37   : >> { %s710_s14 = smov (!%p278_p11, %s708_s14), 4999 }
  0x38   : >> { %s283_s23 = sshll.u32 %s710_s14, 4 }
  0x39   : >> { %s151_s29 = scalar_lea.hbm %s692_s1, %s283_s23 }
  0x3a   : >> { %s400_s30 = scalar_lea.hbm %s151_s29, 16  ;;  %p403_p13 = scmp.lt.s32.totalorder %s151_s29, %s692_s1 }
  0x3b   : >> { %p401_p12 = scmp.ne.s32.totalorder %s151_s29, %s400_s30  ;;  %p404_p0 = scmp.lt.s32.totalorder %s402_s6, %s400_s30 }
  0x3d   : >> { %p405_p1 = por %p404_p0, %p403_p13 }
  0x3f   : >> { %p406_p2 = pnand %p405_p1, %p401_p12 }
  0x41   : >> { %409 = shalt.err (!%p406_p2)  }
  0x42   : >> { %s410_s0 = scalar_lea.vmem %s161_s21, 16  ;;  %s518_s14 = smov [#allocation2]  }
  0x43   : >> { %p411_p3 = scmp.ne.s32.totalorder %s161_s21, %s410_s0  ;;  %s412_s9 = sshll.u32 %s518_s14, 4  ;;  %s413_s9 = int_to_ptr.vmem [resolvable:$false] %s412_s9 }
  0x44   : >> { %s414_s23 = scalar_lea.vmem %s413_s9, 128  ;;  %p415_p5 = scmp.lt.s32.totalorder %s161_s21, %s413_s9 }
  0x45   : >> { %p416_p6 = scmp.lt.s32.totalorder %s414_s23, %s410_s0 }
  0x47   : >> { %p417_p7 = por %p416_p6, %p415_p5 }
  0x49   : >> { %p418_p9 = pnand %p417_p7, %p411_p3 }
  0x4b   : >> { %421 = shalt.err (!%p418_p9)  }
  0x4c   : >> { %163 = dma.hbm_to_vmem [thread:$0]  %s151_s29, 16, %s161_s21, [#allocation3] }
  0x4d   : >> { %s143_s12 = sadd.s32 1, %s514_s12  }
  0x4e   : >> { %p140_p10 = scmp.ge.s32.totalorder %s143_s12, 8  }
  0x50   : > { %142 = sbr.rel (!%p140_p10) target bundleno = 44 (0x2c), region = 75 }
  0x55   : > { %482 = dma.done.wait [#allocation3], 128 }
  0x56   : > { %483 = vsyncadd [#allocation3], 4294967168  ;;  %s285_s25 = sshll.u32 %s502_s18, 7  ;;  %s186_s9 = sshll.u32 %s134_s11, 4  ;;  %v167_v0 = vld [vmem:[#allocation2] sm:$0xff]  ;;  %v168_v1 = vld [vmem:[#allocation6] sm:$0xff]  ;;  %s187_s9 = int_to_ptr.vmem [resolvable:$true] %s186_s9 }
  0x57   : > { %v169_v2 = vadd.f32 %v168_v1, %v167_v0  ;;  %s184_s29 = scalar_lea.hbm %s694_s3, %s285_s25  ;;  %s172_s12 = scalar_lea.sflag [#allocation8], %s132_s8 }
  0x58   : > { %s422_s30 = scalar_lea.vmem %s187_s9, 128  ;;  %s519_s18 = smov [#allocation9]  }
  0x59   : > { %170 = vst [vmem:[%s134_s11] sm:$0xff] %v169_v2  ;;  %p423_p11 = scmp.ne.s32.totalorder %s187_s9, %s422_s30  ;;  %s426_s4 = sshll.u32 %s519_s18, 4  ;;  %s427_s4 = int_to_ptr.vmem [resolvable:$false] %s426_s4 }
  0x5a   : > { %s428_s5 = scalar_lea.vmem %s427_s4, 256  ;;  %p429_p0 = scmp.lt.s32.totalorder %s187_s9, %s427_s4 }
  0x5b   : > { %p424_p12 = pnand %p423_p11, %p583_p4  ;;  %p430_p1 = scmp.lt.s32.totalorder %s428_s5, %s422_s30 }
  0x5d   : > { %p425_p13 = pneg %p424_p12  ;;  %p431_p2 = por %p430_p1, %p429_p0 }
  0x5f   : > { %p432_p3 = pnand %p431_p2, %p425_p13 }
  0x61   : > { %435 = shalt.err (!%p432_p3)
}
  0x62   : > { %s436_s6 = scalar_lea.hbm %s184_s29, 128  ;;  %s440_s11 = scalar_lea.hbm %s694_s3, 256 }
  0x63   : > { %p437_p5 = scmp.ne.s32.totalorder %s184_s29, %s436_s6  ;;  %p441_p9 = scmp.lt.s32.totalorder %s184_s29, %s694_s3 }
  0x64   : > { %p442_p10 = scmp.lt.s32.totalorder %s440_s11, %s436_s6 }
  0x65   : > { %p438_p6 = pnand %p437_p5, %p583_p4 }
  0x66   : > { %p443_p11 = por %p442_p10, %p441_p9 }
  0x67   : > { %p439_p7 = pneg %p438_p6 }
  0x69   : > { %p444_p12 = pnand %p443_p11, %p439_p7 }
  0x6b   : > { %447 = shalt.err (!%p444_p12)
}
  0x6c   : > { %295 = dma.vmem_to_hbm [thread:$0]  (%p583_p4), %s187_s9, 128, %s184_s29, %s172_s12  }
  0x6d PF: > { %p307_p13 = scmp.ge.s32.totalorder %s510_s20, 2  ;;  %s198_s0 = sand.u32 1, %s490_s15  }
  0x6e   : > { %s199_s14 = scalar_lea.sflag [#allocation8], %s198_s0 }
  0x6f   : > { %p302_p0 = pnand %p307_p13, %p590_p8 }
  0x71   : > { %p303_p1 = pneg %p302_p0 }
  0x73   : > { %485 = dma.done.wait (%p303_p1), %s199_s14, 128  }
  0x74   : > { %487 = vsyncadd (%p303_p1), %s199_s14, 4294967168  ;;  %s21_s20 = sadd.s32 1, %s510_s20   ;;  %s700_s15 = smov %s494_s16 }
  0x75   : > { %p18_p2 = scmp.ge.s32.totalorder %s21_s20, 4   ;;  %s701_s16 = smov %s498_s17 }
  0x76   : > { %s702_s17 = smov %s596_s27  ;;  %s703_s18 = smov %s506_s19 }
  0x77   : > { %s704_s19 = smov %s706_s22  ;;  %20 = sbr.rel (!%p18_p2) target bundleno = 10 (0xa), region = 86 }
  0x7c   :  { %204 = vsyncpa [#allocation7], 1 }
  0x7d   :  { %206 = vsyncpa [#allocation7 + $0x1], 1 }
  0x7e   :  { %207 = vsyncpa [#allocation8], 1 }
  0x7f   :  { %209 = vsyncpa [#allocation8 + $0x1], 1 }
  0x80   :  { %210 = vsyncmov [#allocation3] }
  0x83   :  { %s211_s24 = vpop.sfrf %210 }
  0x84   :  { %p288_p4 = scmp.ne.s32.totalorder %s211_s24, 0 }
  0x86   :  { %215 = shalt.err (%p288_p4)  }

</bundles_post_ra>
